<compile_context>
chip_gen: v7x
topology: tpu7x:2x2x1
jax: 0.10.0
libtpu: 0.0.40
codegen_flags: <defaults>
</compile_context>

<pallas_src>
import functools

import jax
import jax.numpy as jnp
from jax.experimental import pallas as pl
from jax.experimental.pallas import tpu as pltpu


def _round_up(x, m):
    return (x + m - 1) // m * m


def _divisor_tile(dim, preferred, align):
    """Largest t <= preferred that divides dim and is a multiple of align.
    Falls back to full extent (always a legal block size)."""
    if dim <= align or dim % align != 0:
        return dim
    t = min(preferred, dim)
    t -= t % align
    while t >= align and dim % t != 0:
        t -= align
    return t if t >= align else dim


def _lane_tile(dim, preferred=512):
    """Lane (last-dim) tile: multiple of 128 dividing dim, else full extent."""
    if dim % 128 != 0:
        return dim
    return _divisor_tile(dim, preferred, 128)


@functools.lru_cache(maxsize=1)
def _vmem_limit_bytes():
    # Generation-aware scoped-VMEM budget: ~48 MiB on v7x (64 MiB physical),
    # ~96 MiB on v5e/v6e (128 MiB physical).
    try:
        cap = int(pltpu.get_tpu_info().vmem_capacity_bytes)
    except Exception:
        cap = 64 * 1024 * 1024
    return min((cap * 3) // 4, 100 * 1024 * 1024)


# ---------------------------------------------------------------------------
# Kernel 1/3: bias-free tiled matmul (QKV projection; qkv_bias=False).
# Grid = (M/tm, N/tn, K/tk); K is the reduction axis (last, "arbitrary");
# f32 VMEM accumulator; bf16 operands on the fast path.
# ---------------------------------------------------------------------------
def _matmul_kernel(x_ref, w_ref, o_ref, acc_ref):
    @pl.when(pl.program_id(2) == 0)
    def _init():
        acc_ref[...] = jnp.zeros(acc_ref.shape, jnp.float32)

    acc_ref[...] += jnp.dot(x_ref[...], w_ref[...],
                            preferred_element_type=jnp.float32)

    @pl.when(pl.program_id(2) == pl.num_programs(2) - 1)
    def _finish():
        o_ref[...] = acc_ref[...].astype(o_ref.dtype)


def _matmul(x, w, out_dtype, *, tm=512, tn=512, tk=512):
    M, K = x.shape
    K2, N = w.shape
    assert K == K2 and M % 8 == 0
    tm = _divisor_tile(M, tm, 8)
    tn = _lane_tile(N, tn)
    tk = _lane_tile(K, tk)

    bytes_io = (M * K * x.dtype.itemsize + K * N * w.dtype.itemsize
                + M * N * jnp.dtype(out_dtype).itemsize)
    return pl.pallas_call(
        _matmul_kernel,
        out_shape=jax.ShapeDtypeStruct((M, N), out_dtype),
        grid_spec=pltpu.PrefetchScalarGridSpec(
            num_scalar_prefetch=0,
            grid=(M // tm, N // tn, K // tk),
            in_specs=[
                pl.BlockSpec((tm, tk), lambda i, j, k: (i, k)),
                pl.BlockSpec((tk, tn), lambda i, j, k: (k, j)),
            ],
            out_specs=pl.BlockSpec((tm, tn), lambda i, j, k: (i, j)),
            scratch_shapes=[pltpu.VMEM((tm, tn), jnp.float32)],
        ),
        compiler_params=pltpu.CompilerParams(
            dimension_semantics=("parallel", "parallel", "arbitrary"),
            vmem_limit_bytes=_vmem_limit_bytes()),
        cost_estimate=pl.CostEstimate(flops=2 * M * N * K, transcendentals=0,
                                      bytes_accessed=bytes_io),
    )(x, w)


# ---------------------------------------------------------------------------
# Kernel 2/3: flash attention with K/V VMEM-resident per (batch, head).
# Grid = (B, H, N_pad//tq); the kv reduction is an in-kernel fori_loop over
# full-sequence K/V blocks (fetched from HBM once per (b, h)).
# q arrives pre-scaled (softmax scale folded into the QKV weight).
# ---------------------------------------------------------------------------
def _flash_attn_kernel(q_ref, k_ref, v_ref, o_ref, *, tk, n_valid, approx_recip):
    q = q_ref[0, 0]                                   # (tq, hd), lane-contiguous
    tq, hd = q.shape
    n_pad = k_ref.shape[2]
    num_kv = n_pad // tk

    def body(kv, carry):
        m_prev, l_prev, acc_prev = carry
        start = pl.multiple_of(kv * tk, tk)
        k = k_ref[0, 0, pl.ds(start, tk), :]          # (tk, hd)
        v = v_ref[0, 0, pl.ds(start, tk), :]          # (tk, hd)
        # Scores (tq, tk): contract over head_dim; kv tile stays on the lane dim.
        s = jax.lax.dot_general(q, k, (((1,), (1,)), ((), ())),
                                preferred_element_type=jnp.float32)
        if n_valid < n_pad:                           # static: emitted only if padded
            col = start + jax.lax.broadcasted_iota(jnp.int32, (tq, tk), 1)
            s = jnp.where(col < n_valid, s, -1e30)
        m_new = jnp.maximum(m_prev, jnp.max(s, axis=-1, keepdims=True))
        alpha = jnp.exp(m_prev - m_new)               # f32 (EUP); portable to v5e
        p = jnp.exp(s - m_new)                        # (tq, tk) f32
        l_new = alpha * l_prev + jnp.sum(p, axis=-1, keepdims=True)
        acc_new = alpha * acc_prev + jax.lax.dot_general(
            p.astype(v.dtype), v, (((1,), (0,)), ((), ())),
            preferred_element_type=jnp.float32)
        return m_new, l_new, acc_new

    m0 = jnp.full((tq, 1), -1e30, jnp.float32)
    l0 = jnp.zeros((tq, 1), jnp.float32)
    a0 = jnp.zeros((tq, hd), jnp.float32)
    _, l, acc = jax.lax.fori_loop(0, num_kv, body, (m0, l0, a0))
    o_ref[0, 0] = (acc * pl.reciprocal(l, approx=approx_recip)).astype(o_ref.dtype)


def _flash_attention(q, k, v, *, n_valid, tq, tk, approx_recip):
    B, H, N_pad, hd = q.shape
    assert N_pad % tq == 0 and N_pad % tk == 0

    kernel = functools.partial(_flash_attn_kernel, tk=tk, n_valid=n_valid,
                               approx_recip=approx_recip)
    flops = 4 * B * H * N_pad * N_pad * hd
    # q, k, v read once each from HBM + output written once (K/V-resident structure).
    bytes_io = 4 * B * H * N_pad * hd * q.dtype.itemsize
    return pl.pallas_call(
        kernel,
        out_shape=jax.ShapeDtypeStruct((B, H, N_pad, hd), q.dtype),
        grid_spec=pltpu.PrefetchScalarGridSpec(
            num_scalar_prefetch=0,
            grid=(B, H, N_pad // tq),
            in_specs=[
                pl.BlockSpec((1, 1, tq, hd), lambda b, h, qi: (b, h, qi, 0)),
                # K / V cover the full sequence for the head: block index is constant
                # across q-tiles, so they are DMA'd from HBM once per (b, h).
                pl.BlockSpec((1, 1, N_pad, hd), lambda b, h, qi: (b, h, 0, 0)),
                pl.BlockSpec((1, 1, N_pad, hd), lambda b, h, qi: (b, h, 0, 0)),
            ],
            out_specs=pl.BlockSpec((1, 1, tq, hd), lambda b, h, qi: (b, h, qi, 0)),
        ),
        compiler_params=pltpu.CompilerParams(
            # B, H first so a v7x megacore split lands on batch/head and keeps the
            # once-per-(b,h) K/V fetch property.
            dimension_semantics=("parallel", "parallel", "parallel"),
            vmem_limit_bytes=_vmem_limit_bytes()),
        cost_estimate=pl.CostEstimate(flops=flops,
                                      transcendentals=B * H * N_pad * N_pad,
                                      bytes_accessed=bytes_io),
    )(q, k, v)


# ---------------------------------------------------------------------------
# Kernel 3/3: output projection with the head merge folded into its reduction
# grid axis:  out[b, n, :] = sum_h ctx[b, h, n, :] @ Wproj[h*hd:(h+1)*hd, :] + bias.
# Removes the ctx.transpose(0, 2, 1, 3) HBM round-trip of the previous version.
# ---------------------------------------------------------------------------
def _proj_headmerge_kernel(x_ref, w_ref, b_ref, o_ref, acc_ref):
    h = pl.program_id(3)

    @pl.when(h == 0)
    def _init():
        acc_ref[...] = jnp.zeros(acc_ref.shape, jnp.float32)

    acc_ref[...] += jnp.dot(x_ref[0, 0], w_ref[0],
                            preferred_element_type=jnp.float32)

    @pl.when(h == pl.num_programs(3) - 1)
    def _finish():
        o_ref[0] = (acc_ref[...] + b_ref[...].astype(jnp.float32)).astype(o_ref.dtype)


def _proj_headmerge(ctx, w_heads, bias, out_dtype, *, tm=512, tn=512):
    B, H, N_pad, hd = ctx.shape
    H2, hd2, C = w_heads.shape
    assert H == H2 and hd == hd2
    tm = _divisor_tile(N_pad, tm, 8)
    tn = _lane_tile(C, tn)

    bytes_io = (ctx.size * ctx.dtype.itemsize
                + w_heads.size * w_heads.dtype.itemsize
                + bias.size * bias.dtype.itemsize
                + B * N_pad * C * jnp.dtype(out_dtype).itemsize)
    return pl.pallas_call(
        _proj_headmerge_kernel,
        out_shape=jax.ShapeDtypeStruct((B, N_pad, C), out_dtype),
        grid_spec=pltpu.PrefetchScalarGridSpec(
            num_scalar_prefetch=0,
            grid=(B, N_pad // tm, C // tn, H),
            in_specs=[
                pl.BlockSpec((1, 1, tm, hd), lambda b, i, j, h: (b, h, i, 0)),
                pl.BlockSpec((1, hd, tn), lambda b, i, j, h: (h, 0, j)),
                pl.BlockSpec((1, tn), lambda b, i, j, h: (0, j)),
            ],
            out_specs=pl.BlockSpec((1, tm, tn), lambda b, i, j, h: (b, i, j)),
            scratch_shapes=[pltpu.VMEM((tm, tn), jnp.float32)],
        ),
        compiler_params=pltpu.CompilerParams(
            dimension_semantics=("parallel", "parallel", "parallel", "arbitrary"),
            vmem_limit_bytes=_vmem_limit_bytes()),
        cost_estimate=pl.CostEstimate(flops=2 * B * N_pad * C * H * hd,
                                      transcendentals=0,
                                      bytes_accessed=bytes_io),
    )(ctx, w_heads, bias)


# ---------------------------------------------------------------------------
# Wrapper: matches torch Attention.forward semantics.
# ---------------------------------------------------------------------------
def attention_forward(x, wqkv, wproj, bproj, *, num_heads,
                      compute_dtype=jnp.bfloat16):
    """x: (B, N, C); wqkv: (3C, C) PyTorch Linear layout; wproj: (C, C); bproj: (C,)."""
    B, N, C = x.shape
    assert C % num_heads == 0
    H = num_heads
    hd = C // H
    scale = hd ** -0.5

    # Sequence padding keeps the flash tiles (8,128)-aligned; padded kv positions
    # are masked in-kernel and padded q rows are sliced off at the end.
    tq = tk = 256 if N >= 256 else _round_up(N, 8)
    N_pad = _round_up(N, tq)

    # Weights in x @ W layout; softmax scale folded into the q columns of the QKV
    # weight (q comes out pre-scaled at zero runtime cost).
    wqkv_t = wqkv.T                                            # (C, 3C)
    col_scale = jnp.concatenate(
        [jnp.full((C,), scale, wqkv_t.dtype), jnp.ones((2 * C,), wqkv_t.dtype)])
    wqkv_t = wqkv_t * col_scale[None, :]
    wproj_t = wproj.T                                          # (C, C)

    # Cast MXU operands ONCE here (bf16 fast path); accumulation stays f32 in-kernel.
    x_c = x.astype(compute_dtype)
    if N_pad != N:
        x_c = jnp.pad(x_c, ((0, 0), (0, N_pad - N), (0, 0)))
    wqkv_c = wqkv_t.astype(compute_dtype)
    wproj_c = wproj_t.astype(compute_dtype)
    bproj_2d = bproj.reshape(1, C).astype(jnp.float32)

    # 1) QKV projection (qkv_bias=False -> bias-free kernel, no zero-bias DMA).
    qkv2d = _matmul(x_c.reshape(B * N_pad, C), wqkv_c, compute_dtype)   # (B*N_pad, 3C)

    # Head split (wrapper-side layout plumbing; per-head column slicing from the
    # packed 3C layout would need sub-128-lane BlockSpecs when head_dim < 128).
    qkv = qkv2d.reshape(B, N_pad, 3, H, hd).transpose(2, 0, 3, 1, 4)
    q, k, v = qkv[0], qkv[1], qkv[2]                           # (B, H, N_pad, hd)

    # 2) Flash attention: K/V VMEM-resident per (b, h), online softmax in f32.
    approx = jnp.dtype(compute_dtype) != jnp.dtype(jnp.float32)
    ctx = _flash_attention(q, k, v, n_valid=N, tq=tq, tk=tk,
                           approx_recip=approx)                # (B, H, N_pad, hd)

    # 3) Output projection with the head merge folded into its reduction axis.
    w_heads = wproj_c.reshape(H, hd, C)                        # row group h = head h
    out = _proj_headmerge(ctx, w_heads, bproj_2d, x.dtype)     # (B, N_pad, C)
    return out[:, :N, :]


def attention_reference(x, wqkv, wproj, bproj, *, num_heads):
    """Pure-JAX f32 reference mirroring the PyTorch forward."""
    B, N, C = x.shape
    hd = C // num_heads
    scale = hd ** -0.5
    qkv = x @ wqkv.T                                           # (B, N, 3C)
    qkv = qkv.reshape(B, N, 3, num_heads, hd).transpose(2, 0, 3, 1, 4)
    q, k, v = qkv[0], qkv[1], qkv[2]                           # (B, H, N, hd)
    attn = (q @ jnp.swapaxes(k, -2, -1)) * scale               # (B, H, N, N)
    attn = jax.nn.softmax(attn, axis=-1)
    out = (attn @ v).transpose(0, 2, 1, 3).reshape(B, N, C)
    return out @ wproj.T + bproj


if __name__ == "__main__":
    # Small shapes consistent with the module: B=2, N=8 (seq), C=32 (dim), 8 heads.
    B, N, C = 2, 8, 32
    num_heads = 8

    key = jax.random.PRNGKey(0)
    k_x, k_qkv, k_proj, k_bias = jax.random.split(key, 4)

    x = jax.random.normal(k_x, (B, N, C), dtype=jnp.float32)
    # PyTorch Linear layout: (out_features, in_features).
    wqkv = jax.random.normal(k_qkv, (3 * C, C), dtype=jnp.float32) * (C ** -0.5)
    wproj = jax.random.normal(k_proj, (C, C), dtype=jnp.float32) * (C ** -0.5)
    bproj = jax.random.normal(k_bias, (C,), dtype=jnp.float32) * 0.02

    ref = attention_reference(x, wqkv, wproj, bproj, num_heads=num_heads)

    # f32 validation path (exact reciprocal, tight tolerance).
    out_f32 = attention_forward(x, wqkv, wproj, bproj, num_heads=num_heads,
                                compute_dtype=jnp.float32)
    out_f32 = jax.block_until_ready(out_f32)
    assert out_f32.shape == (B, N, C)
    assert jnp.allclose(out_f32, ref, atol=1e-4, rtol=1e-4), "f32 path mismatch"

    # bf16 fast path (default): bf16 MXU operands, f32 accumulation, approx recip.
    out_bf16 = attention_forward(x, wqkv, wproj, bproj, num_heads=num_heads)
    out_bf16 = jax.block_until_ready(out_bf16)
    assert out_bf16.shape == (B, N, C)
    assert jnp.allclose(out_bf16, ref, atol=1.5e-1, rtol=1.5e-1), "bf16 path mismatch"

    print("KERNEL_OK")
</pallas_src>

<mosaic_0001>
module attributes {stable_mosaic.version = 11 : i64} {
  func.func @_matmul_kernel(%arg0: i32, %arg1: i32, %arg2: i32, %arg3: memref<16x32xf32, #tpu.memory_space<vmem>>, %arg4: memref<32x96xf32, #tpu.memory_space<vmem>>, %arg5: memref<16x96xf32, #tpu.memory_space<vmem>>, %arg6: memref<16x96xf32, #tpu.memory_space<vmem>>) attributes {dimension_semantics = [#tpu.dimension_semantics<parallel>, #tpu.dimension_semantics<parallel>, #tpu.dimension_semantics<arbitrary>], iteration_bounds = array<i64: 1, 1, 1>, scalar_prefetch = 0 : i64, scratch_operands = 1 : i64, tpu.core_type = #tpu.core_type<tc>, window_params = [{transform_indices = @transform_0, window_bounds = array<i64: 16, 32>}, {transform_indices = @transform_1, window_bounds = array<i64: 32, 96>}, {transform_indices = @transform_2, window_bounds = array<i64: 16, 96>}]} {
    %c0_i32 = arith.constant 0 : i32
    %0 = arith.cmpi eq, %arg2, %c0_i32 : i32
    %1 = arith.extui %0 : i1 to i32
    %c0_i32_0 = arith.constant 0 : i32
    %2 = arith.cmpi ne, %1, %c0_i32_0 : i32
    scf.if %2 {
      %cst_10 = arith.constant 0.000000e+00 : f32
      %12 = vector.broadcast %cst_10 : f32 to vector<16x96xf32>
      %c0_11 = arith.constant 0 : index
      %c0_12 = arith.constant 0 : index
      %13 = vector.load %arg6[%c0_11, %c0_12] : memref<16x96xf32, #tpu.memory_space<vmem>>, vector<16x96xf32>
      tpu.vector_store %arg6[%c0_11, %c0_12], %12 {strides = array<i32>} : memref<16x96xf32, #tpu.memory_space<vmem>>, vector<16x96xf32>,
    } else {
    }
    %c0 = arith.constant 0 : index
    %c0_1 = arith.constant 0 : index
    %3 = vector.load %arg6[%c0, %c0_1] : memref<16x96xf32, #tpu.memory_space<vmem>>, vector<16x96xf32>
    %c0_2 = arith.constant 0 : index
    %c0_3 = arith.constant 0 : index
    %4 = vector.load %arg3[%c0_2, %c0_3] : memref<16x32xf32, #tpu.memory_space<vmem>>, vector<16x32xf32>
    %c0_4 = arith.constant 0 : index
    %c0_5 = arith.constant 0 : index
    %5 = vector.load %arg4[%c0_4, %c0_5] : memref<32x96xf32, #tpu.memory_space<vmem>>, vector<32x96xf32>
    %cst = arith.constant dense<0.000000e+00> : vector<16x96xf32>
    %6 = tpu.matmul %4, %5, %cst {dimension_numbers = #tpu.dot_dimension_numbers<[1], [0], [0], [1], [0, 0, 1, 1], [], []>} : vector<16x32xf32>, vector<32x96xf32>, vector<16x96xf32> -> vector<16x96xf32>
    %7 = arith.addf %3, %6 : vector<16x96xf32>
    %c0_6 = arith.constant 0 : index
    %c0_7 = arith.constant 0 : index
    %8 = vector.load %arg6[%c0_6, %c0_7] : memref<16x96xf32, #tpu.memory_space<vmem>>, vector<16x96xf32>
    tpu.vector_store %arg6[%c0_6, %c0_7], %7 {strides = array<i32>} : memref<16x96xf32, #tpu.memory_space<vmem>>, vector<16x96xf32>,
    %c0_i32_8 = arith.constant 0 : i32
    %9 = arith.cmpi eq, %arg2, %c0_i32_8 : i32
    %10 = arith.extui %9 : i1 to i32
    %c0_i32_9 = arith.constant 0 : i32
    %11 = arith.cmpi ne, %10, %c0_i32_9 : i32
    scf.if %11 {
      %c0_10 = arith.constant 0 : index
      %c0_11 = arith.constant 0 : index
      %12 = vector.load %arg6[%c0_10, %c0_11] : memref<16x96xf32, #tpu.memory_space<vmem>>, vector<16x96xf32>
      %c0_12 = arith.constant 0 : index
      %c0_13 = arith.constant 0 : index
      %13 = vector.load %arg5[%c0_12, %c0_13] : memref<16x96xf32, #tpu.memory_space<vmem>>, vector<16x96xf32>
      tpu.vector_store %arg5[%c0_12, %c0_13], %12 {strides = array<i32>} : memref<16x96xf32, #tpu.memory_space<vmem>>, vector<16x96xf32>,
    } else {
    }
    return
  }
  func.func @transform_0(%arg0: i32, %arg1: i32, %arg2: i32) -> (i32, i32) {
    %c0_i32 = arith.constant 0 : i32
    return %arg0, %arg2 : i32, i32
  }
  func.func @transform_1(%arg0: i32, %arg1: i32, %arg2: i32) -> (i32, i32) {
    %c0_i32 = arith.constant 0 : i32
    return %arg2, %arg1 : i32, i32
  }
  func.func @transform_2(%arg0: i32, %arg1: i32, %arg2: i32) -> (i32, i32) {
    %c0_i32 = arith.constant 0 : i32
    return %arg0, %arg1 : i32, i32
  }
}

</mosaic_0001>

<bundles_post_ra>
// kernel: tpu_custom_call.1
= control target key start
LH: loop header
LB: loop body
LE: loop exit
PB: predicated region body
PF: predicated region fallthrough
CT: control target
= control target key end

     0   :  { %7 = vsyncpa [#allocation4], 0  ;;  %s344_s0 = inlined_call_operand.hbm [shape: f32[16,32], index: 0, kind: input, shape index: {}]   ;;  %s345_s1 = inlined_call_operand.hbm [shape: f32[32,96], index: 1, kind: input, shape index: {}]   ;;  %s346_s2 = inlined_call_operand.hbm [shape: f32[16,96], index: 2, kind: output, shape index: {}]  }
   0x1   :  { %8 = vsyncpa [#allocation7], 0 }
   0x2   :  { %9 = vsyncpa [#allocation5], 0  ;;  %s272_s9 = smov [#allocation3]   ;;  %s200_s13 = scalar_lea.hbm %s344_s0, 256 }
   0x3   :  { %s15_s10 = sshll.u32 %s272_s9, 4  ;;  %p201_p0 = scmp.ne.s32.totalorder %s344_s0, %s200_s13  ;;  %s16_s10 = int_to_ptr.vmem [resolvable:$true] %s15_s10 }
   0x4   :  { %p204_p1 = scmp.lt.u32.totalorder %s200_s13, %s344_s0 }
   0x6   :  { %p206_p2 = pnand %p204_p1, %p201_p0 }
   0x8   :  { %209 = shalt.err (!%p206_p2)
}
   0x9   :  { %s210_s18 = scalar_lea.vmem %s16_s10, 256  ;;  %p215_p4 = scmp.lt.s32.totalorder %s16_s10, %s16_s10 }
   0xa   :  { %p211_p3 = scmp.ne.s32.totalorder %s16_s10, %s210_s18  ;;  %p216_p5 = scmp.lt.s32.totalorder %s210_s18, %s210_s18 }
   0xc   :  { %p217_p6 = por %p216_p5, %p215_p4 }
   0xe   :  { %p218_p7 = pnand %p217_p6, %p211_p3 }
  0x10   :  { %221 = shalt.err (!%p218_p7)
}
  0x11   :  { %s273_s19 = smov 128   ;;  %s274_s20 = smov 8  }
  0x12   :  { %21 = dma.hbm_to_vmem [thread:$0]  %s344_s0, 256, %s16_s10, [#allocation4], %s273_s19, %s273_s19, %s274_s20  }
  0x13   :  { %s275_s23 = smov [#allocation6]   ;;  %s222_s27 = scalar_lea.hbm %s345_s1, 512 }
  0x14   :  { %s27_s24 = sshll.u32 %s275_s23, 4  ;;  %p223_p8 = scmp.ne.s32.totalorder %s345_s1, %s222_s27  ;;  %s28_s24 = int_to_ptr.vmem [resolvable:$true] %s27_s24 }
  0x15   :  { %p226_p9 = scmp.lt.u32.totalorder %s222_s27, %s345_s1 }
  0x17   :  { %p228_p10 = pnand %p226_p9, %p223_p8 }
  0x19   :  { %231 = shalt.err (!%p228_p10)
}
  0x1a   :  { %s232_s4 = scalar_lea.vmem %s28_s24, 512  ;;  %p237_p12 = scmp.lt.s32.totalorder %s28_s24, %s28_s24 }
  0x1b   :  { %p233_p11 = scmp.ne.s32.totalorder %s28_s24, %s232_s4  ;;  %p238_p13 = scmp.lt.s32.totalorder %s232_s4, %s232_s4 }
  0x1d   :  { %p239_p0 = por %p238_p13, %p237_p12 }
  0x1f   :  { %p240_p1 = pnand %p239_p0, %p233_p11 }
  0x21   :  { %243 = shalt.err (!%p240_p1)
}
  0x22   :  { %33 = dma.hbm_to_vmem [thread:$0]  %s345_s1, 512, %s28_s24, [#allocation7], %s273_s19, %s273_s19, %s274_s20  }
  0x23   :  { %266 = dma.done.wait [#allocation4], 256  }
  0x24   :  { %267 = vsyncadd [#allocation4], 4294967040 }
  0x25   :  { %268 = dma.done.wait [#allocation7], 512  }
  0x26   :  { %269 = vsyncadd [#allocation7], 4294966784  ;;  %vm44_vm0 = vcmask 785408   ;;  %v276_v0 = vmov 0.0   ;;  %vm55_vm1 = vcmask 261120   ;;  %v51_v1 = vld [vmem:[#allocation6] sm:$0xff] }
  0x27   :  { %46 = vst.msk [vmem:[#allocation2 + $0x8] sm:$0xff] %vm44_vm0, %v276_v0  ;;  %45 = vst.msk [vmem:[#allocation2] sm:$0xff] %vm44_vm0, %v276_v0  ;;  %v52_v2 = vld [vmem:[#allocation6 + $0x8] sm:$0xff]  ;;  %v53_v3 = vld [vmem:[#allocation6 + $0x10] sm:$0xff]  ;;  %s277_s1 = smov [#allocation8]  }
  0x28   :  { %v186_v4 = vpack.c.bf16 %v52_v2, %v51_v1  ;;  %v54_v5 = vld [vmem:[#allocation6 + $0x18] sm:$0xff]  ;;  %v49_v6 = vld [vmem:[#allocation3] sm:$0xff]  ;;  %s154_s6 = sshll.u32 %s277_s1, 4  ;;  %s155_s6 = int_to_ptr.vmem [resolvable:$true] %s154_s6 }
  0x29   :  { %v190_v7 = vpack.c.bf16 %v54_v5, %v53_v3  ;;  %183 = vmatprep.mubr.msk.f32.mxu0 %vm55_vm1, %v49_v6  ;;  %v50_v8 = vld [vmem:[#allocation3 + $0x8] sm:$0xff]  ;;  %s244_s7 = scalar_lea.vmem %s155_s6, 256  ;;  %p249_p3 = scmp.lt.s32.totalorder %s155_s6, %s155_s6 }
  0x2a   :  { %187 = vmatprep.subr.bf16.mxu0 %v186_v4  ;;  %p245_p2 = scmp.ne.s32.totalorder %s155_s6, %s244_s7  ;;  %p250_p4 = scmp.lt.s32.totalorder %s244_s7, %s244_s7 }
  0x2b   :  { %189 = vmatpush3.bf16.msra.mxu0 %v186_v4 }
  0x2c   :  { %191 = vmatprep.subr.bf16.mxu0 %v190_v7  ;;  %p251_p5 = por %p250_p4, %p249_p3 }
  0x2e   :  { %v48_v9 = vld [vmem:[#allocation2 + $0x8] sm:$0xff]  ;;  %v47_v10 = vld [vmem:[#allocation2] sm:$0xff]  ;;  %p252_p6 = pnand %p251_p5, %p245_p2 }
  0x2f   :  { %193 = vmatpush3.bf16.msra.mxu0 %v190_v7 }
  0x32   :  { %184 = vmatmul.mubr.msk.f32.vlgmr.msra.gmra.mrb[0].mxu0 %vm55_vm1, %v50_v8 }
 0x105   :  { %v185_v11 = vpop.f32.mrb[0].mxu0 }
 0x106   :  { %v138_v12 = vadd.f32 %v185_v11, %v48_v9  ;;  %v128_v13 = vpop.f32.mrb[1].mxu0 }
 0x107   :  { %v137_v14 = vadd.f32 %v128_v13, %v47_v10 }
 0x108   :  { %141 = vst.msk [vmem:[#allocation2 + $0x8] sm:$0xff] %vm44_vm0, %v138_v12 }
 0x109   :  { %140 = vst.msk [vmem:[#allocation2] sm:$0xff] %vm44_vm0, %v137_v14 }
 0x10f   :  { %v146_v15 = vld [vmem:[#allocation2 + $0x8] sm:$0xff] }
 0x110   :  { %v145_v16 = vld [vmem:[#allocation2] sm:$0xff]  ;;  %148 = vst.msk [vmem:[#allocation8 + $0x8] sm:$0xff] %vm44_vm0, %v146_v15 }
 0x111   :  { %147 = vst.msk [vmem:[#allocation8] sm:$0xff] %vm44_vm0, %v145_v16 }
 0x112   :  { %255 = shalt.err (!%p252_p6)
}
 0x113   :  { %s256_s10 = scalar_lea.hbm %s346_s2, 256 }
 0x114   :  { %p257_p7 = scmp.ne.s32.totalorder %s346_s2, %s256_s10  ;;  %p260_p8 = scmp.lt.u32.totalorder %s256_s10, %s346_s2 }
 0x116   :  { %p262_p9 = pnand %p260_p8, %p257_p7 }
 0x118   :  { %265 = shalt.err (!%p262_p9)
}
 0x119   :  { %160 = dma.vmem_to_hbm [thread:$0]  %s155_s6, 256, %s346_s2, [#allocation5], %s273_s19, %s273_s19, %s274_s20  }
 0x11a   :  { %270 = dma.done.wait [#allocation5], 256  }
 0x11b   :  { %271 = vsyncadd [#allocation5], 4294967040 }
 0x11c   :  { %164 = vsyncpa [#allocation4], 1 }
 0x11d   :  { %165 = vsyncpa [#allocation7], 1 }
 0x11e   :  { %166 = vsyncpa [#allocation5], 1 }

</bundles_post_ra>
